<compile_context>
chip_gen: v6e
topology: v6e:2x2x1
jax: 0.10.0
libtpu: 0.0.40
codegen_flags: <defaults>
</compile_context>

<pallas_src>
import jax
import jax.numpy as jnp
from jax.experimental import pallas as pl
from jax.experimental.pallas import tpu as pltpu


def _attention_kernel(x_ref, w1e_ref, b1e_ref, w2e_ref, e_ref, s_ref, b2_ref, o_ref):
    # x_ref  : (bn, D*P)   lane-dense streamed block, flat lane index l = d*P + p
    # w1e_ref: (D*P, P*H)  block-diagonal expansion of W1 (x dtype)
    # b1e_ref: (1, P*H)    b1 tiled over the P patch positions (f32)
    # w2e_ref: (P*H, P)    block-diagonal expansion of W2 (f32)
    # e_ref  : (P, D*P)    0/1 replication matrix: attn[p] -> lanes d*P+p (f32)
    # s_ref  : (D*P, D)    0/1 segment-sum matrix: sum over p of lanes d*P+p (x dtype)
    # b2_ref : (1,)        scalar bias in SMEM
    # o_ref  : (bn, D)
    x = x_ref[...]                                             # native dtype, no upcast

    # ---- layer 1: pre[n, p*H+j] = sum_d x[n, d, p] * W1[d, j] ------------------
    # One big MXU matmul (contraction depth D*P); no transpose/reshape of x.
    h = jnp.tanh(
        jnp.dot(x, w1e_ref[...], preferred_element_type=jnp.float32) + b1e_ref[...]
    )                                                          # (bn, P*H) f32

    # ---- layer 2: logits[n, p] = tanh(sum_j h[n, p*H+j] * W2[j] + b2) ----------
    logits = jnp.tanh(
        jnp.dot(h, w2e_ref[...], preferred_element_type=jnp.float32) + b2_ref[0]
    )                                                          # (bn, P) f32

    # ---- softmax over the P = K*K patch positions (lane reduction) -------------
    m = jnp.max(logits, axis=-1, keepdims=True)
    e = jnp.exp(logits - m)
    attn = e / jnp.sum(e, axis=-1, keepdims=True)              # (bn, P) f32

    # ---- broadcast attn back to the flat lane layout: attn_exp[n, d*P+p] = attn[n, p]
    attn_exp = jnp.dot(attn, e_ref[...], preferred_element_type=jnp.float32)  # (bn, D*P)

    # ---- attention-weighted pooling: out[n, d] = sum_p x[n, d*P+p] * attn[n, p]
    y = x * attn_exp.astype(x.dtype)
    o_ref[...] = jnp.dot(
        y, s_ref[...], preferred_element_type=jnp.float32
    ).astype(o_ref.dtype)


def _pick_block_n(n, d, p, h, itemsize):
    """Frames per grid step.  Sized so the double-buffered lane-dense x block,
    the f32 intermediates (h, attn_exp, y) and the resident expanded weights
    stay around ~20 MiB -- safe on every generation (v7x: 64 MiB VMEM/TC) once
    vmem_limit_bytes is raised.  Keeps >= 2 grid steps for large N so the
    'parallel' grid axis can feed both v7x TensorCores."""
    dp, ph = d * p, p * h
    per_frame = 2 * dp * itemsize + 8 * ph + 8 * dp + 8 * d        # bytes / frame
    fixed = 8 * (dp * ph + ph * p + p * dp + dp * d + ph + p)      # resident weights (2 bufs)
    budget = (20 << 20) - fixed
    bn = max(64, min(budget // per_frame, 2048))
    if n >= 128:                       # keep at least 2 grid steps for megacore
        bn = min(bn, -(-n // 2))
    bn = max(8, (bn // 8) * 8)
    return int(min(bn, max(8, -(-n // 8) * 8)))


def attention_learned_forward(outhigh, params, *, sequence, img_dim, kernel_size):
    """outhigh: any array viewable as (-1, img_dim, kernel_size**2), e.g. NCHW
    (N, img_dim, K, K).  Returns (N // sequence, sequence, img_dim)."""
    P = kernel_size * kernel_size
    D = img_dim

    # view(-1, D, K*K) then flatten (D, P) -> D*P: pure reshapes of a contiguous
    # tensor (free in XLA).  The kernel streams a lane-dense (N, D*P) slab, so
    # each grid step is one fully contiguous HBM read.
    x = outhigh.reshape(-1, D * P)
    N = x.shape[0]
    xdt = x.dtype
    f32 = jnp.float32

    w1, b1, w2, b2 = params                      # (D,H), (1,H), (H,1), (1,1)
    H = w1.shape[1]

    # Block-diagonal / replication matrices so every step of the computation is
    # a plain MXU matmul on the flat (d*P+p) lane layout (no in-kernel relayout).
    eyeP = jnp.eye(P, dtype=f32)
    w1e = (w1.astype(f32)[:, None, None, :] * eyeP[None, :, :, None]
           ).reshape(D * P, P * H).astype(xdt)                        # (D*P, P*H)
    b1e = jnp.tile(b1.reshape(1, H).astype(f32), (1, P))              # (1, P*H)
    w2e = (eyeP[:, None, :] * w2.reshape(H).astype(f32)[None, :, None]
           ).reshape(P * H, P)                                        # (P*H, P)
    e_mat = jnp.tile(eyeP, (1, D))                                    # (P, D*P)
    s_mat = jnp.repeat(jnp.eye(D, dtype=f32), P, axis=0).astype(xdt)  # (D*P, D)
    b2_s = b2.reshape(1).astype(f32)                                  # SMEM scalar

    bn = _pick_block_n(N, D, P, H, xdt.itemsize)
    n_blocks = -(-N // bn)
    N_pad = n_blocks * bn
    if N_pad != N:
        x = jnp.pad(x, ((0, N_pad - N), (0, 0)))

    cost = pl.CostEstimate(
        flops=2 * N_pad * (D * P * P * H + P * H * P + P * D * P + D * P * D),
        transcendentals=N_pad * (P * H + 2 * P),
        bytes_accessed=(N_pad * D * P * xdt.itemsize
                        + N_pad * D * xdt.itemsize
                        + (D * P * P * H + P * H + P * H * P + P * D * P + D * P * D + 1) * 4),
    )

    out = pl.pallas_call(
        _attention_kernel,
        out_shape=jax.ShapeDtypeStruct((N_pad, D), outhigh.dtype),
        grid_spec=pltpu.PrefetchScalarGridSpec(
            num_scalar_prefetch=0,
            grid=(n_blocks,),
            in_specs=[
                pl.BlockSpec((bn, D * P), lambda i: (i, 0)),       # streamed x (contiguous DMA)
                pl.BlockSpec((D * P, P * H), lambda i: (0, 0)),    # resident W1e
                pl.BlockSpec((1, P * H), lambda i: (0, 0)),        # resident b1e
                pl.BlockSpec((P * H, P), lambda i: (0, 0)),        # resident W2e
                pl.BlockSpec((P, D * P), lambda i: (0, 0)),        # resident E (attn broadcast)
                pl.BlockSpec((D * P, D), lambda i: (0, 0)),        # resident S (segment sum)
                pl.BlockSpec(memory_space=pltpu.MemorySpace.SMEM), # b2 scalar
            ],
            out_specs=pl.BlockSpec((bn, D), lambda i: (i, 0)),
        ),
        compiler_params=pltpu.CompilerParams(
            dimension_semantics=("parallel",),          # shard N-blocks across TCs (v7x)
            vmem_limit_bytes=45 * 1024 * 1024,          # block sizing targets ~20 MiB used
        ),
        cost_estimate=cost,
    )(x, w1e, b1e, w2e, e_mat, s_mat, b2_s)

    if N_pad != N:
        out = out[:N]
    return out.reshape(-1, sequence, D)


def init_params(key, img_dim, bottle_neck):
    """Deterministic init mirroring nn.Linear shapes:
       Linear(img_dim, bottle_neck) and Linear(bottle_neck, 1)."""
    k1, k2, k3, k4 = jax.random.split(key, 4)
    lim1 = 1.0 / jnp.sqrt(img_dim)
    lim2 = 1.0 / jnp.sqrt(bottle_neck)
    w1 = jax.random.uniform(k1, (img_dim, bottle_neck), jnp.float32, -lim1, lim1)
    b1 = jax.random.uniform(k2, (1, bottle_neck), jnp.float32, -lim1, lim1)
    w2 = jax.random.uniform(k3, (bottle_neck, 1), jnp.float32, -lim2, lim2)
    b2 = jax.random.uniform(k4, (1, 1), jnp.float32, -lim2, lim2)
    return (w1, b1, w2, b2)


def _reference_forward(outhigh, params, *, sequence, img_dim, kernel_size):
    """Plain-JAX reference (mirrors the PyTorch forward) for verification."""
    w1, b1, w2, b2 = params
    P = kernel_size * kernel_size
    x = outhigh.reshape(-1, img_dim, P).transpose(0, 2, 1)          # (N, P, D)
    h = jnp.tanh(x @ w1 + b1[None])                                 # (N, P, H)
    logits = jnp.tanh(h @ w2 + b2[None]).squeeze(-1)                # (N, P)
    attn = jax.nn.softmax(logits, axis=-1)[..., None]               # (N, P, 1)
    desc = jnp.sum(x * attn, axis=1)                                # (N, D)
    return desc.reshape(-1, sequence, img_dim)


if __name__ == "__main__":
    # small, module-consistent shapes
    batch = 2
    sequence = 4
    kernel_size = 4          # -> P = 16 patch positions
    img_dim = 32             # feature dim D
    bottle_neck = 16         # hidden H

    key = jax.random.PRNGKey(0)
    k_x, k_p = jax.random.split(key)

    # PyTorch-style NCHW input: (batch*sequence, img_dim, K, K)
    outhigh = jax.random.normal(
        k_x, (batch * sequence, img_dim, kernel_size, kernel_size), jnp.float32
    )
    params = init_params(k_p, img_dim, bottle_neck)

    out = attention_learned_forward(
        outhigh, params, sequence=sequence, img_dim=img_dim, kernel_size=kernel_size
    )
    out = jax.block_until_ready(out)

    ref = _reference_forward(
        outhigh, params, sequence=sequence, img_dim=img_dim, kernel_size=kernel_size
    )
    assert out.shape == (batch, sequence, img_dim), out.shape
    assert jnp.allclose(out, ref, atol=2e-3, rtol=2e-3), "mismatch vs reference"

    # TODO(synk): self.conv (Conv1d) exists in the module but is unused in
    # forward(), so it is intentionally not implemented.
    print("KERNEL_OK")
</pallas_src>

<mosaic_0001>
module attributes {stable_mosaic.version = 11 : i64} {
  func.func @_attention_kernel(%arg0: i32, %arg1: memref<8x512xf32, #tpu.memory_space<vmem>>, %arg2: memref<512x256xf32, #tpu.memory_space<vmem>>, %arg3: memref<1x256xf32, #tpu.memory_space<vmem>>, %arg4: memref<256x16xf32, #tpu.memory_space<vmem>>, %arg5: memref<16x512xf32, #tpu.memory_space<vmem>>, %arg6: memref<512x32xf32, #tpu.memory_space<vmem>>, %arg7: memref<1xf32, #tpu.memory_space<smem>>, %arg8: memref<8x32xf32, #tpu.memory_space<vmem>>) attributes {dimension_semantics = [#tpu.dimension_semantics<parallel>], iteration_bounds = array<i64: 1>, scalar_prefetch = 0 : i64, scratch_operands = 0 : i64, tpu.core_type = #tpu.core_type<tc>, window_params = [{transform_indices = @transform_0, window_bounds = array<i64: 8, 512>}, {pipeline_mode = #tpu.pipeline_mode<synchronous>, transform_indices = @transform_1, window_bounds = array<i64: 512, 256>}, {pipeline_mode = #tpu.pipeline_mode<synchronous>, transform_indices = @transform_2, window_bounds = array<i64: 1, 256>}, {pipeline_mode = #tpu.pipeline_mode<synchronous>, transform_indices = @transform_3, window_bounds = array<i64: 256, 16>}, {pipeline_mode = #tpu.pipeline_mode<synchronous>, transform_indices = @transform_4, window_bounds = array<i64: 16, 512>}, {pipeline_mode = #tpu.pipeline_mode<synchronous>, transform_indices = @transform_5, window_bounds = array<i64: 512, 32>}, {transform_indices = @transform_6, window_bounds = array<i64: 1>}, {transform_indices = @transform_7, window_bounds = array<i64: 8, 32>}]} {
    %c0 = arith.constant 0 : index
    %c0_0 = arith.constant 0 : index
    %0 = vector.load %arg1[%c0, %c0_0] : memref<8x512xf32, #tpu.memory_space<vmem>>, vector<8x512xf32>
    %c0_1 = arith.constant 0 : index
    %c0_2 = arith.constant 0 : index
    %1 = vector.load %arg2[%c0_1, %c0_2] : memref<512x256xf32, #tpu.memory_space<vmem>>, vector<512x256xf32>
    %cst = arith.constant dense<0.000000e+00> : vector<8x256xf32>
    %2 = tpu.matmul %0, %1, %cst {dimension_numbers = #tpu.dot_dimension_numbers<[1], [0], [0], [1], [0, 0, 1, 1], [], []>} : vector<8x512xf32>, vector<512x256xf32>, vector<8x256xf32> -> vector<8x256xf32>
    %c0_3 = arith.constant 0 : index
    %c0_4 = arith.constant 0 : index
    %3 = vector.load %arg3[%c0_3, %c0_4] : memref<1x256xf32, #tpu.memory_space<vmem>>, vector<1x256xf32>
    %4 = vector.broadcast %3 : vector<1x256xf32> to vector<8x256xf32>
    %5 = arith.addf %2, %4 : vector<8x256xf32>
    %6 = math.tanh %5 : vector<8x256xf32>
    %c0_5 = arith.constant 0 : index
    %c0_6 = arith.constant 0 : index
    %7 = vector.load %arg4[%c0_5, %c0_6] : memref<256x16xf32, #tpu.memory_space<vmem>>, vector<256x16xf32>
    %cst_7 = arith.constant dense<0.000000e+00> : vector<8x16xf32>
    %8 = tpu.matmul %6, %7, %cst_7 {dimension_numbers = #tpu.dot_dimension_numbers<[1], [0], [0], [1], [0, 0, 1, 1], [], []>} : vector<8x256xf32>, vector<256x16xf32>, vector<8x16xf32> -> vector<8x16xf32>
    %c0_8 = arith.constant 0 : index
    %9 = memref.load %arg7[%c0_8] : memref<1xf32, #tpu.memory_space<smem>>
    %10 = vector.broadcast %9 : f32 to vector<8x16xf32>
    %11 = arith.addf %8, %10 : vector<8x16xf32>
    %12 = math.tanh %11 : vector<8x16xf32>
    %cst_9 = arith.constant dense<0xFF800000> : vector<8xf32>
    %13 = vector.multi_reduction <maximumf>, %12, %cst_9 [1] : vector<8x16xf32> to vector<8xf32>
    %14 = vector.shape_cast %13 : vector<8xf32> to vector<8x1xf32>
    %15 = vector.broadcast %14 : vector<8x1xf32> to vector<8x16xf32>
    %16 = arith.subf %12, %15 : vector<8x16xf32>
    %17 = math.exp %16 : vector<8x16xf32>
    %cst_10 = arith.constant dense<0.000000e+00> : vector<8xf32>
    %18 = vector.multi_reduction <add>, %17, %cst_10 [1] : vector<8x16xf32> to vector<8xf32>
    %19 = vector.shape_cast %18 : vector<8xf32> to vector<8x1xf32>
    %20 = vector.broadcast %19 : vector<8x1xf32> to vector<8x16xf32>
    %21 = arith.divf %17, %20 : vector<8x16xf32>
    %c0_11 = arith.constant 0 : index
    %c0_12 = arith.constant 0 : index
    %22 = vector.load %arg5[%c0_11, %c0_12] : memref<16x512xf32, #tpu.memory_space<vmem>>, vector<16x512xf32>
    %cst_13 = arith.constant dense<0.000000e+00> : vector<8x512xf32>
    %23 = tpu.matmul %21, %22, %cst_13 {dimension_numbers = #tpu.dot_dimension_numbers<[1], [0], [0], [1], [0, 0, 1, 1], [], []>} : vector<8x16xf32>, vector<16x512xf32>, vector<8x512xf32> -> vector<8x512xf32>
    %24 = arith.mulf %0, %23 : vector<8x512xf32>
    %c0_14 = arith.constant 0 : index
    %c0_15 = arith.constant 0 : index
    %25 = vector.load %arg6[%c0_14, %c0_15] : memref<512x32xf32, #tpu.memory_space<vmem>>, vector<512x32xf32>
    %cst_16 = arith.constant dense<0.000000e+00> : vector<8x32xf32>
    %26 = tpu.matmul %24, %25, %cst_16 {dimension_numbers = #tpu.dot_dimension_numbers<[1], [0], [0], [1], [0, 0, 1, 1], [], []>} : vector<8x512xf32>, vector<512x32xf32>, vector<8x32xf32> -> vector<8x32xf32>
    %c0_17 = arith.constant 0 : index
    %c0_18 = arith.constant 0 : index
    %27 = vector.load %arg8[%c0_17, %c0_18] : memref<8x32xf32, #tpu.memory_space<vmem>>, vector<8x32xf32>
    tpu.vector_store %arg8[%c0_17, %c0_18], %26 {strides = array<i32>} : memref<8x32xf32, #tpu.memory_space<vmem>>, vector<8x32xf32>,
    return
  }
  func.func @transform_0(%arg0: i32) -> (i32, i32) {
    %c0_i32 = arith.constant 0 : i32
    %c0_i32_0 = arith.constant 0 : i32
    return %arg0, %c0_i32 : i32, i32
  }
  func.func @transform_1(%arg0: i32) -> (i32, i32) {
    %c0_i32 = arith.constant 0 : i32
    %c0_i32_0 = arith.constant 0 : i32
    %c0_i32_1 = arith.constant 0 : i32
    return %c0_i32, %c0_i32_0 : i32, i32
  }
  func.func @transform_2(%arg0: i32) -> (i32, i32) {
    %c0_i32 = arith.constant 0 : i32
    %c0_i32_0 = arith.constant 0 : i32
    %c0_i32_1 = arith.constant 0 : i32
    return %c0_i32, %c0_i32_0 : i32, i32
  }
  func.func @transform_3(%arg0: i32) -> (i32, i32) {
    %c0_i32 = arith.constant 0 : i32
    %c0_i32_0 = arith.constant 0 : i32
    %c0_i32_1 = arith.constant 0 : i32
    return %c0_i32, %c0_i32_0 : i32, i32
  }
  func.func @transform_4(%arg0: i32) -> (i32, i32) {
    %c0_i32 = arith.constant 0 : i32
    %c0_i32_0 = arith.constant 0 : i32
    %c0_i32_1 = arith.constant 0 : i32
    return %c0_i32, %c0_i32_0 : i32, i32
  }
  func.func @transform_5(%arg0: i32) -> (i32, i32) {
    %c0_i32 = arith.constant 0 : i32
    %c0_i32_0 = arith.constant 0 : i32
    %c0_i32_1 = arith.constant 0 : i32
    return %c0_i32, %c0_i32_0 : i32, i32
  }
  func.func @transform_6(%arg0: i32) -> i32 {
    %c0_i32 = arith.constant 0 : i32
    %c0_i32_0 = arith.constant 0 : i32
    return %c0_i32 : i32
  }
  func.func @transform_7(%arg0: i32) -> (i32, i32) {
    %c0_i32 = arith.constant 0 : i32
    %c0_i32_0 = arith.constant 0 : i32
    return %arg0, %c0_i32 : i32, i32
  }
}

</mosaic_0001>

<bundles_post_ra>
// kernel: tpu_custom_call.1
= control target key start
LH: loop header
LB: loop body
LE: loop exit
PB: predicated region body
PF: predicated region fallthrough
CT: control target
= control target key end

     0   :  { %13 = vsyncpa [#allocation4], 0  ;;  %s1392_s0 = inlined_call_operand.vmem [shape: f32[8,512], index: 0, kind: input, shape index: {}]   ;;  %s1393_s1 = inlined_call_operand.hbm [shape: f32[512,256], index: 1, kind: input, shape index: {}]   ;;  %s1394_s2 = inlined_call_operand.vmem [shape: f32[1,256], index: 2, kind: input, shape index: {}]   ;;  %s1395_s3 = inlined_call_operand.vmem [shape: f32[256,16], index: 3, kind: input, shape index: {}]   ;;  %s1396_s4 = inlined_call_operand.vmem [shape: f32[16,512], index: 4, kind: input, shape index: {}]   ;;  %s1397_s5 = inlined_call_operand.vmem [shape: f32[512,32], index: 5, kind: input, shape index: {}]   ;;  %s1398_s6 = inlined_call_operand.<no memory space> [shape: f32[1], index: 6, kind: input, shape index: {}]   ;;  %s1399_s7 = inlined_call_operand.hbm [shape: f32[8,32], index: 7, kind: output, shape index: {}]  }
   0x1   :  { %14 = vsyncpa [#allocation5], 0  ;;  %s991_s24 = smov [#allocation3]  }
   0x2   :  { %s22_s25 = sshll.u32 %s991_s24, 4  ;;  %s23_s25 = int_to_ptr.vmem [resolvable:$true] %s22_s25 }
   0x3   :  { %s955_s26 = scalar_lea.vmem %s23_s25, 16384  ;;  %p960_p1 = scmp.lt.s32.totalorder %s23_s25, %s23_s25 }
   0x4   :  { %p956_p0 = scmp.ne.s32.totalorder %s23_s25, %s955_s26  ;;  %p961_p2 = scmp.lt.s32.totalorder %s955_s26, %s955_s26 }
   0x6   :  { %p962_p3 = por %p961_p2, %p960_p1 }
   0x8   :  { %p963_p4 = pnand %p962_p3, %p956_p0 }
   0xa   :  { %966 = shalt.err (!%p963_p4)
}
   0xb   :  { %s992_s27 = smov 256   ;;  %s993_s28 = smov 16  }
   0xc   :  { %28 = dma.hbm_to_vmem [thread:$0]  %s1393_s1, 16384, %s23_s25, [#allocation4], %s992_s27, %s992_s27, %s993_s28  }
   0xd   :  { %987 = dma.done.wait [#allocation4], 16384  }
   0xe   :  { %988 = vsyncadd [#allocation4], 4294950912  ;;  %v77_v0 = vld [vmem:[#allocation3 + $0xf8] sm:$0xff]  ;;  %v76_v2 = vld [vmem:[#allocation3 + $0xf0] sm:$0xff]  ;;  %vm435_vm0 = vcmask 130048   ;;  %vm808_vm1 = vcmask 261120  }
   0xf   :  { %v141_v1 = vld [vmem:[#allocation3 + $0x2f8] sm:$0xff]  ;;  %186 = vmatprep.subr.mxu0 %v77_v0  ;;  %v140_v3 = vld [vmem:[#allocation3 + $0x2f0] sm:$0xff]  ;;  %v75_v4 = vld [vmem:[#allocation3 + $0xe8] sm:$0xff] }
  0x10   :  { %257 = vmatprep.subr.mxu1 %v141_v1  ;;  %v139_v5 = vld [vmem:[#allocation3 + $0x2e8] sm:$0xff]  ;;  %187 = vmatpush1.msra.mxu0 %v76_v2  ;;  %v74_v6 = vld [vmem:[#allocation3 + $0xe0] sm:$0xff]  ;;  %v73_v8 = vld [vmem:[#allocation3 + $0xd8] sm:$0xff] }
  0x11   :  { %258 = vmatpush1.msra.mxu1 %v140_v3  ;;  %v138_v7 = vld [vmem:[#allocation3 + $0x2e0] sm:$0xff]  ;;  %188 = vmatprep.subr.mxu0 %v75_v4  ;;  %v137_v9 = vld [vmem:[#allocation3 + $0x2d8] sm:$0xff]  ;;  %v72_v10 = vld [vmem:[#allocation3 + $0xd0] sm:$0xff] }
  0x12   :  { %259 = vmatprep.subr.mxu1 %v139_v5  ;;  %v136_v11 = vld [vmem:[#allocation3 + $0x2d0] sm:$0xff]  ;;  %189 = vmatpush1.msra.mxu0 %v74_v6  ;;  %v71_v12 = vld [vmem:[#allocation3 + $0xc8] sm:$0xff]  ;;  %v70_v14 = vld [vmem:[#allocation3 + $0xc0] sm:$0xff] }
  0x13   :  { %260 = vmatpush1.msra.mxu1 %v138_v7  ;;  %v135_v13 = vld [vmem:[#allocation3 + $0x2c8] sm:$0xff]  ;;  %190 = vmatprep.subr.mxu0 %v73_v8  ;;  %v134_v15 = vld [vmem:[#allocation3 + $0x2c0] sm:$0xff]  ;;  %v69_v16 = vld [vmem:[#allocation3 + $0xb8] sm:$0xff] }
  0x14   :  { %261 = vmatprep.subr.mxu1 %v137_v9  ;;  %191 = vmatpush1.msra.mxu0 %v72_v10  ;;  %v133_v17 = vld [vmem:[#allocation3 + $0x2b8] sm:$0xff]  ;;  %v68_v18 = vld [vmem:[#allocation3 + $0xb0] sm:$0xff]  ;;  %v67_v20 = vld [vmem:[#allocation3 + $0xa8] sm:$0xff] }
  0x15   :  { %262 = vmatpush1.msra.mxu1 %v136_v11  ;;  %192 = vmatprep.subr.mxu0 %v71_v12  ;;  %v132_v19 = vld [vmem:[#allocation3 + $0x2b0] sm:$0xff]  ;;  %v131_v21 = vld [vmem:[#allocation3 + $0x2a8] sm:$0xff]  ;;  %v66_v22 = vld [vmem:[#allocation3 + $0xa0] sm:$0xff] }
  0x16   :  { %263 = vmatprep.subr.mxu1 %v135_v13  ;;  %193 = vmatpush1.msra.mxu0 %v70_v14  ;;  %v130_v23 = vld [vmem:[#allocation3 + $0x2a0] sm:$0xff]  ;;  %v65_v24 = vld [vmem:[#allocation3 + $0x98] sm:$0xff]  ;;  %v64_v26 = vld [vmem:[#allocation3 + $0x90] sm:$0xff] }
  0x17   :  { %264 = vmatpush1.msra.mxu1 %v134_v15  ;;  %194 = vmatprep.subr.mxu0 %v69_v16  ;;  %v129_v25 = vld [vmem:[#allocation3 + $0x298] sm:$0xff]  ;;  %v128_v27 = vld [vmem:[#allocation3 + $0x290] sm:$0xff]  ;;  %v63_v28 = vld [vmem:[#allocation3 + $0x88] sm:$0xff] }
  0x18   :  { %265 = vmatprep.subr.mxu1 %v133_v17  ;;  %195 = vmatpush1.msra.mxu0 %v68_v18  ;;  %v127_v29 = vld [vmem:[#allocation3 + $0x288] sm:$0xff]  ;;  %v62_v30 = vld [vmem:[#allocation3 + $0x80] sm:$0xff]  ;;  %v61_v32 = vld [vmem:[#allocation3 + $0x78] sm:$0xff] }
  0x19   :  { %266 = vmatpush1.msra.mxu1 %v132_v19  ;;  %196 = vmatprep.subr.mxu0 %v67_v20  ;;  %v126_v31 = vld [vmem:[#allocation3 + $0x280] sm:$0xff]  ;;  %v125_v33 = vld [vmem:[#allocation3 + $0x278] sm:$0xff]  ;;  %v60_v34 = vld [vmem:[#allocation3 + $0x70] sm:$0xff] }
  0x1a   :  { %267 = vmatprep.subr.mxu1 %v131_v21  ;;  %197 = vmatpush1.msra.mxu0 %v66_v22  ;;  %v124_v35 = vld [vmem:[#allocation3 + $0x270] sm:$0xff]  ;;  %v59_v36 = vld [vmem:[#allocation3 + $0x68] sm:$0xff]  ;;  %v58_v38 = vld [vmem:[#allocation3 + $0x60] sm:$0xff] }
  0x1b   :  { %268 = vmatpush1.msra.mxu1 %v130_v23  ;;  %198 = vmatprep.subr.mxu0 %v65_v24  ;;  %v123_v37 = vld [vmem:[#allocation3 + $0x268] sm:$0xff]  ;;  %v122_v39 = vld [vmem:[#allocation3 + $0x260] sm:$0xff]  ;;  %v57_v40 = vld [vmem:[#allocation3 + $0x58] sm:$0xff] }
  0x1c   :  { %269 = vmatprep.subr.mxu1 %v129_v25  ;;  %199 = vmatpush1.msra.mxu0 %v64_v26  ;;  %v121_v41 = vld [vmem:[#allocation3 + $0x258] sm:$0xff]  ;;  %v56_v42 = vld [vmem:[#allocation3 + $0x50] sm:$0xff]  ;;  %v55_v44 = vld [vmem:[#allocation3 + $0x48] sm:$0xff] }
  0x1d   :  { %270 = vmatpush1.msra.mxu1 %v128_v27  ;;  %200 = vmatprep.subr.mxu0 %v63_v28  ;;  %v120_v43 = vld [vmem:[#allocation3 + $0x250] sm:$0xff]  ;;  %v119_v45 = vld [vmem:[#allocation3 + $0x248] sm:$0xff]  ;;  %v54_v46 = vld [vmem:[#allocation3 + $0x40] sm:$0xff] }
  0x1e   :  { %271 = vmatprep.subr.mxu1 %v127_v29  ;;  %201 = vmatpush1.msra.mxu0 %v62_v30  ;;  %v118_v47 = vld [vmem:[#allocation3 + $0x240] sm:$0xff]  ;;  %v53_v48 = vld [vmem:[#allocation3 + $0x38] sm:$0xff]  ;;  %v52_v50 = vld [vmem:[#allocation3 + $0x30] sm:$0xff] }
  0x1f   :  { %272 = vmatpush1.msra.mxu1 %v126_v31  ;;  %202 = vmatprep.subr.mxu0 %v61_v32  ;;  %v117_v49 = vld [vmem:[#allocation3 + $0x238] sm:$0xff]  ;;  %v116_v51 = vld [vmem:[#allocation3 + $0x230] sm:$0xff]  ;;  %v51_v52 = vld [vmem:[#allocation3 + $0x28] sm:$0xff] }
  0x20   :  { %273 = vmatprep.subr.mxu1 %v125_v33  ;;  %203 = vmatpush1.msra.mxu0 %v60_v34  ;;  %v115_v53 = vld [vmem:[#allocation3 + $0x228] sm:$0xff]  ;;  %v50_v54 = vld [vmem:[#allocation3 + $0x20] sm:$0xff]  ;;  %v49_v56 = vld [vmem:[#allocation3 + $0x18] sm:$0xff] }
  0x21   :  { %274 = vmatpush1.msra.mxu1 %v124_v35  ;;  %204 = vmatprep.subr.mxu0 %v59_v36  ;;  %v114_v55 = vld [vmem:[#allocation3 + $0x220] sm:$0xff]  ;;  %v113_v57 = vld [vmem:[#allocation3 + $0x218] sm:$0xff]  ;;  %v48_v58 = vld [vmem:[#allocation3 + $0x10] sm:$0xff] }
  0x22   :  { %275 = vmatprep.subr.mxu1 %v123_v37  ;;  %205 = vmatpush1.msra.mxu0 %v58_v38  ;;  %v112_v59 = vld [vmem:[#allocation3 + $0x210] sm:$0xff]  ;;  %v47_v60 = vld [vmem:[#allocation3 + $0x8] sm:$0xff]  ;;  %v46_v62 = vld [vmem:[#allocation3] sm:$0xff] }
  0x23   :  { %276 = vmatpush1.msra.mxu1 %v122_v39  ;;  %206 = vmatprep.subr.mxu0 %v57_v40  ;;  %v111_v61 = vld [vmem:[#allocation3 + $0x208] sm:$0xff]  ;;  %v110_v63 = vld [vmem:[#allocation3 + $0x200] sm:$0xff]  ;;  %v109_v0 = vld [vmem:[#allocation3 + $0x1f8] sm:$0xff] }
  0x24   :  { %277 = vmatprep.subr.mxu1 %v121_v41  ;;  %207 = vmatpush1.msra.mxu0 %v56_v42  ;;  %v173_v1 = vld [vmem:[#allocation3 + $0x3f8] sm:$0xff]  ;;  %v108_v2 = vld [vmem:[#allocation3 + $0x1f0] sm:$0xff]  ;;  %v107_v4 = vld [vmem:[#allocation3 + $0x1e8] sm:$0xff] }
  0x25   :  { %278 = vmatpush1.msra.mxu1 %v120_v43  ;;  %208 = vmatprep.subr.mxu0 %v55_v44  ;;  %v172_v3 = vld [vmem:[#allocation3 + $0x3f0] sm:$0xff]  ;;  %v171_v5 = vld [vmem:[#allocation3 + $0x3e8] sm:$0xff]  ;;  %v106_v6 = vld [vmem:[#allocation3 + $0x1e0] sm:$0xff] }
  0x26   :  { %279 = vmatprep.subr.mxu1 %v119_v45  ;;  %209 = vmatpush1.msra.mxu0 %v54_v46  ;;  %v170_v7 = vld [vmem:[#allocation3 + $0x3e0] sm:$0xff]  ;;  %v105_v8 = vld [vmem:[#allocation3 + $0x1d8] sm:$0xff]  ;;  %v104_v10 = vld [vmem:[#allocation3 + $0x1d0] sm:$0xff] }
  0x27   :  { %280 = vmatpush1.msra.mxu1 %v118_v47  ;;  %210 = vmatprep.subr.mxu0 %v53_v48  ;;  %v169_v9 = vld [vmem:[#allocation3 + $0x3d8] sm:$0xff]  ;;  %v168_v11 = vld [vmem:[#allocation3 + $0x3d0] sm:$0xff]  ;;  %v103_v12 = vld [vmem:[#allocation3 + $0x1c8] sm:$0xff] }
  0x28   :  { %281 = vmatprep.subr.mxu1 %v117_v49  ;;  %211 = vmatpush1.msra.mxu0 %v52_v50  ;;  %v167_v13 = vld [vmem:[#allocation3 + $0x3c8] sm:$0xff]  ;;  %v102_v14 = vld [vmem:[#allocation3 + $0x1c0] sm:$0xff]  ;;  %v101_v16 = vld [vmem:[#allocation3 + $0x1b8] sm:$0xff] }
  0x29   :  { %282 = vmatpush1.msra.mxu1 %v116_v51  ;;  %212 = vmatprep.subr.mxu0 %v51_v52  ;;  %v166_v15 = vld [vmem:[#allocation3 + $0x3c0] sm:$0xff]  ;;  %v165_v17 = vld [vmem:[#allocation3 + $0x3b8] sm:$0xff]  ;;  %v100_v18 = vld [vmem:[#allocation3 + $0x1b0] sm:$0xff] }
  0x2a   :  { %283 = vmatprep.subr.mxu1 %v115_v53  ;;  %213 = vmatpush1.msra.mxu0 %v50_v54  ;;  %v164_v19 = vld [vmem:[#allocation3 + $0x3b0] sm:$0xff]  ;;  %v99_v20 = vld [vmem:[#allocation3 + $0x1a8] sm:$0xff]  ;;  %v98_v22 = vld [vmem:[#allocation3 + $0x1a0] sm:$0xff] }
  0x2b   :  { %284 = vmatpush1.msra.mxu1 %v114_v55  ;;  %214 = vmatprep.subr.mxu0 %v49_v56  ;;  %v163_v21 = vld [vmem:[#allocation3 + $0x3a8] sm:$0xff]  ;;  %v162_v23 = vld [vmem:[#allocation3 + $0x3a0] sm:$0xff]  ;;  %v97_v24 = vld [vmem:[#allocation3 + $0x198] sm:$0xff] }
  0x2c   :  { %285 = vmatprep.subr.mxu1 %v113_v57  ;;  %215 = vmatpush1.msra.mxu0 %v48_v58  ;;  %v161_v25 = vld [vmem:[#allocation3 + $0x398] sm:$0xff]  ;;  %v96_v26 = vld [vmem:[#allocation3 + $0x190] sm:$0xff]  ;;  %v95_v28 = vld [vmem:[#allocation3 + $0x188] sm:$0xff] }
  0x2d   :  { %286 = vmatpush1.msra.mxu1 %v112_v59  ;;  %216 = vmatprep.subr.mxu0 %v47_v60  ;;  %v160_v27 = vld [vmem:[#allocation3 + $0x390] sm:$0xff]  ;;  %v159_v29 = vld [vmem:[#allocation3 + $0x388] sm:$0xff]  ;;  %v94_v30 = vld [vmem:[#allocation3 + $0x180] sm:$0xff] }
  0x2e   :  { %287 = vmatprep.subr.mxu1 %v111_v61  ;;  %217 = vmatpush1.msra.mxu0 %v46_v62  ;;  %v158_v31 = vld [vmem:[#allocation3 + $0x380] sm:$0xff]  ;;  %v93_v32 = vld [vmem:[#allocation3 + $0x178] sm:$0xff]  ;;  %v92_v34 = vld [vmem:[#allocation3 + $0x170] sm:$0xff] }
  0x2f   :  { %288 = vmatpush1.msra.mxu1 %v110_v63  ;;  %218 = vmatprep.subr.mxu0 %v109_v0  ;;  %v157_v33 = vld [vmem:[#allocation3 + $0x378] sm:$0xff]  ;;  %v156_v35 = vld [vmem:[#allocation3 + $0x370] sm:$0xff]  ;;  %v91_v36 = vld [vmem:[#allocation3 + $0x168] sm:$0xff] }
  0x30   :  { %289 = vmatprep.subr.mxu1 %v173_v1  ;;  %219 = vmatpush2.msra.mxu0 %v108_v2  ;;  %v155_v37 = vld [vmem:[#allocation3 + $0x368] sm:$0xff]  ;;  %v90_v38 = vld [vmem:[#allocation3 + $0x160] sm:$0xff]  ;;  %v89_v40 = vld [vmem:[#allocation3 + $0x158] sm:$0xff] }
  0x31   :  { %290 = vmatpush2.msra.mxu1 %v172_v3  ;;  %220 = vmatprep.subr.mxu0 %v107_v4  ;;  %v154_v39 = vld [vmem:[#allocation3 + $0x360] sm:$0xff]  ;;  %v153_v41 = vld [vmem:[#allocation3 + $0x358] sm:$0xff]  ;;  %v88_v42 = vld [vmem:[#allocation3 + $0x150] sm:$0xff] }
  0x32   :  { %291 = vmatprep.subr.mxu1 %v171_v5  ;;  %221 = vmatpush2.msra.mxu0 %v106_v6  ;;  %v152_v43 = vld [vmem:[#allocation3 + $0x350] sm:$0xff]  ;;  %v87_v44 = vld [vmem:[#allocation3 + $0x148] sm:$0xff]  ;;  %v86_v46 = vld [vmem:[#allocation3 + $0x140] sm:$0xff] }
  0x33   :  { %292 = vmatpush2.msra.mxu1 %v170_v7  ;;  %222 = vmatprep.subr.mxu0 %v105_v8  ;;  %v151_v45 = vld [vmem:[#allocation3 + $0x348] sm:$0xff]  ;;  %v150_v47 = vld [vmem:[#allocation3 + $0x340] sm:$0xff]  ;;  %v85_v48 = vld [vmem:[#allocation3 + $0x138] sm:$0xff] }
  0x34   :  { %293 = vmatprep.subr.mxu1 %v169_v9  ;;  %223 = vmatpush2.msra.mxu0 %v104_v10  ;;  %v149_v49 = vld [vmem:[#allocation3 + $0x338] sm:$0xff]  ;;  %v84_v50 = vld [vmem:[#allocation3 + $0x130] sm:$0xff]  ;;  %v83_v52 = vld [vmem:[#allocation3 + $0x128] sm:$0xff] }
  0x35   :  { %294 = vmatpush2.msra.mxu1 %v168_v11  ;;  %224 = vmatprep.subr.mxu0 %v103_v12  ;;  %v148_v51 = vld [vmem:[#allocation3 + $0x330] sm:$0xff]  ;;  %v147_v53 = vld [vmem:[#allocation3 + $0x328] sm:$0xff]  ;;  %v82_v54 = vld [vmem:[#allocation3 + $0x120] sm:$0xff] }
  0x36   :  { %295 = vmatprep.subr.mxu1 %v167_v13  ;;  %225 = vmatpush2.msra.mxu0 %v102_v14  ;;  %v146_v55 = vld [vmem:[#allocation3 + $0x320] sm:$0xff]  ;;  %v81_v56 = vld [vmem:[#allocation3 + $0x118] sm:$0xff]  ;;  %v80_v58 = vld [vmem:[#allocation3 + $0x110] sm:$0xff] }
  0x37   :  { %296 = vmatpush2.msra.mxu1 %v166_v15  ;;  %226 = vmatprep.subr.mxu0 %v101_v16  ;;  %v145_v57 = vld [vmem:[#allocation3 + $0x318] sm:$0xff]  ;;  %v144_v59 = vld [vmem:[#allocation3 + $0x310] sm:$0xff]  ;;  %v79_v60 = vld [vmem:[#allocation3 + $0x108] sm:$0xff] }
  0x38   :  { %297 = vmatprep.subr.mxu1 %v165_v17  ;;  %227 = vmatpush2.msra.mxu0 %v100_v18  ;;  %v143_v61 = vld [vmem:[#allocation3 + $0x308] sm:$0xff]  ;;  %v78_v62 = vld [vmem:[#allocation3 + $0x100] sm:$0xff]  ;;  %v1047_v1 = vld [vmem:[%s1392_s0 + $0x18] sm:$0xff] }
  0x39   :  { %298 = vmatpush2.msra.mxu1 %v164_v19  ;;  %228 = vmatprep.subr.mxu0 %v99_v20  ;;  %v1042_v63 = vld [vmem:[%s1392_s0 + $0x8] sm:$0xff]  ;;  %v142_v0 = vld [vmem:[#allocation3 + $0x300] sm:$0xff]  ;;  %v1057_v3 = vld [vmem:[%s1392_s0 + $0x10] sm:$0xff] }
  0x3a   :  { %299 = vmatprep.subr.mxu1 %v163_v21  ;;  %229 = vmatpush2.msra.mxu0 %v98_v22  ;;  %v1052_v2 = vld [vmem:[%s1392_s0] sm:$0xff]  ;;  %v361_v4 = vld [vmem:[%s1395_s3 + $0xf8] sm:$0xff]  ;;  %v360_v6 = vld [vmem:[%s1395_s3 + $0xf0] sm:$0xff] }
  0x3b   :  { %300 = vmatpush2.msra.mxu1 %v162_v23  ;;  %230 = vmatprep.subr.mxu0 %v97_v24  ;;  %v345_v5 = vld [vmem:[%s1395_s3 + $0x78] sm:$0xff]  ;;  %v344_v7 = vld [vmem:[%s1395_s3 + $0x70] sm:$0xff]  ;;  %v359_v8 = vld [vmem:[%s1395_s3 + $0xe8] sm:$0xff] }
  0x3c   :  { %301 = vmatprep.subr.mxu1 %v161_v25  ;;  %231 = vmatpush2.msra.mxu0 %v96_v26  ;;  %v343_v9 = vld [vmem:[%s1395_s3 + $0x68] sm:$0xff]  ;;  %v358_v10 = vld [vmem:[%s1395_s3 + $0xe0] sm:$0xff]  ;;  %v357_v12 = vld [vmem:[%s1395_s3 + $0xd8] sm:$0xff] }
  0x3d   :  { %302 = vmatpush2.msra.mxu1 %v160_v27  ;;  %232 = vmatprep.subr.mxu0 %v95_v28  ;;  %v342_v11 = vld [vmem:[%s1395_s3 + $0x60] sm:$0xff]  ;;  %v341_v13 = vld [vmem:[%s1395_s3 + $0x58] sm:$0xff]  ;;  %v356_v14 = vld [vmem:[%s1395_s3 + $0xd0] sm:$0xff] }
  0x3e   :  { %303 = vmatprep.subr.mxu1 %v159_v29  ;;  %233 = vmatpush2.msra.mxu0 %v94_v30  ;;  %v340_v15 = vld [vmem:[%s1395_s3 + $0x50] sm:$0xff]  ;;  %v355_v16 = vld [vmem:[%s1395_s3 + $0xc8] sm:$0xff]  ;;  %v354_v18 = vld [vmem:[%s1395_s3 + $0xc0] sm:$0xff] }
  0x3f   :  { %304 = vmatpush2.msra.mxu1 %v158_v31  ;;  %234 = vmatprep.subr.mxu0 %v93_v32  ;;  %v339_v17 = vld [vmem:[%s1395_s3 + $0x48] sm:$0xff]  ;;  %v338_v19 = vld [vmem:[%s1395_s3 + $0x40] sm:$0xff]  ;;  %v353_v20 = vld [vmem:[%s1395_s3 + $0xb8] sm:$0xff] }
  0x40   :  { %305 = vmatprep.subr.mxu1 %v157_v33  ;;  %235 = vmatpush2.msra.mxu0 %v92_v34  ;;  %v337_v21 = vld [vmem:[%s1395_s3 + $0x38] sm:$0xff]  ;;  %v352_v22 = vld [vmem:[%s1395_s3 + $0xb0] sm:$0xff]  ;;  %v351_v24 = vld [vmem:[%s1395_s3 + $0xa8] sm:$0xff] }
  0x41   :  { %306 = vmatpush2.msra.mxu1 %v156_v35  ;;  %236 = vmatprep.subr.mxu0 %v91_v36  ;;  %v336_v23 = vld [vmem:[%s1395_s3 + $0x30] sm:$0xff]  ;;  %v335_v25 = vld [vmem:[%s1395_s3 + $0x28] sm:$0xff]  ;;  %v350_v26 = vld [vmem:[%s1395_s3 + $0xa0] sm:$0xff]  ;;  %v176_v36 = vlaneseq }
  0x42   :  { %307 = vmatprep.subr.mxu1 %v155_v37  ;;  %237 = vmatpush2.msra.mxu0 %v90_v38  ;;  %v334_v27 = vld [vmem:[%s1395_s3 + $0x20] sm:$0xff]  ;;  %v349_v28 = vld [vmem:[%s1395_s3 + $0x98] sm:$0xff]  ;;  %v348_v30 = vld [vmem:[%s1395_s3 + $0x90] sm:$0xff] }
  0x43   :  { %308 = vmatpush2.msra.mxu1 %v154_v39  ;;  %238 = vmatprep.subr.mxu0 %v89_v40  ;;  %v333_v29 = vld [vmem:[%s1395_s3 + $0x18] sm:$0xff]  ;;  %v332_v31 = vld [vmem:[%s1395_s3 + $0x10] sm:$0xff]  ;;  %v347_v32 = vld [vmem:[%s1395_s3 + $0x88] sm:$0xff]  ;;  %v177_v37 = vshrl.u32 %v176_v36, 7 }
  0x44   :  { %309 = vmatprep.subr.mxu1 %v153_v41  ;;  %239 = vmatpush2.msra.mxu0 %v88_v42  ;;  %v331_v33 = vld [vmem:[%s1395_s3 + $0x8] sm:$0xff]  ;;  %v346_v34 = vld [vmem:[%s1395_s3 + $0x80] sm:$0xff]  ;;  %v453_v36 = vld [vmem:[%s1396_s4 + $0x30] sm:$0xff] }
  0x45   :  { %310 = vmatpush2.msra.mxu1 %v152_v43  ;;  %240 = vmatprep.subr.mxu0 %v87_v44  ;;  %v330_v35 = vld [vmem:[%s1395_s3] sm:$0xff]  ;;  %v178_v38 = vsub.s32 0, %v177_v37  ;;  %v182_v40 = vsub.s32 1, %v177_v37  ;;  %v450_v37 = vld [vmem:[%s1396_s4 + $0x18] sm:$0xff] }
  0x46   :  { %311 = vmatprep.subr.mxu1 %v151_v45  ;;  %241 = vmatpush2.msra.mxu0 %v86_v46  ;;  %v174_v39 = vld [vmem:[%s1394_s2] sm:$0x3] }
  0x47   :  { %312 = vmatpush2.msra.mxu1 %v150_v47  ;;  %242 = vmatprep.subr.mxu0 %v85_v48  ;;  %v179_v41 = vrot.slane %v174_v39, %v178_v38  ;;  %v183_v42 = vrot.slane %v174_v39, %v182_v40  ;;  %v449_v38 = vld [vmem:[%s1396_s4 + $0x10] sm:$0xff]  ;;  %v635_v39 = vld [vmem:[%s1397_s5 + $0xf8] sm:$0xff] }
  0x48   :  { %313 = vmatprep.subr.mxu1 %v149_v49  ;;  %243 = vmatpush2.msra.mxu0 %v84_v50  ;;  %v619_v40 = vld [vmem:[%s1397_s5 + $0x78] sm:$0xff] }
  0x49   :  { %314 = vmatpush2.msra.mxu1 %v148_v51  ;;  %244 = vmatprep.subr.mxu0 %v83_v52 }
  0x4a   :  { %315 = vmatprep.subr.mxu1 %v147_v53  ;;  %245 = vmatpush2.msra.mxu0 %v82_v54  ;;  %v363_v54 = vstv %s1398_s6 }
  0x4b   :  { %316 = vmatpush2.msra.mxu1 %v146_v55  ;;  %246 = vmatprep.subr.mxu0 %v81_v56 }
  0x4c   :  { %317 = vmatprep.subr.mxu1 %v145_v57  ;;  %247 = vmatpush2.msra.mxu0 %v80_v58 }
  0x4d   :  { %318 = vmatpush2.msra.mxu1 %v144_v59  ;;  %248 = vmatprep.subr.mxu0 %v79_v60 }
  0x4e   :  { %319 = vmatprep.subr.mxu1 %v143_v61  ;;  %249 = vmatpush2.msra.mxu0 %v78_v62 }
  0x4f   :  { %250 = vmatprep.mubr.f32.mxu0 %v1042_v63  ;;  %320 = vmatpush2.msra.mxu1 %v142_v0 }
  0x50   :  { %321 = vmatprep.mubr.f32.mxu1 %v1047_v1  ;;  %251 = vmatmul.mubr.f32.vlgmr.msra.gmra.mxu0 %v1052_v2 }
  0x51   :  { %322 = vmatmul.mubr.f32.vlgmr.msra.gmra.mxu1 %v1057_v3  ;;  %827 = vmatprep.subr.mxu0 %v361_v4 }
  0x52   :  { %828 = vmatpush3.msra.mxu0 %v345_v5  ;;  %v452_v5 = vld [vmem:[%s1396_s4 + $0x28] sm:$0xff] }
  0x53   :  { %829 = vmatprep.subr.mxu0 %v360_v6  ;;  %v451_v6 = vld [vmem:[%s1396_s4 + $0x20] sm:$0xff]  ;;  %486 = vmatprep.subr.mxu1 %v452_v5  ;;  %v622_v5 = vld [vmem:[%s1397_s5 + $0x90] sm:$0xff] }
  0x54   :  { %830 = vmatpush3.msra.mxu0 %v344_v7  ;;  %v448_v7 = vld [vmem:[%s1396_s4 + $0x8] sm:$0xff]  ;;  %487 = vmatpush1.msra.mxu1 %v451_v6  ;;  %v656_v6 = vld [vmem:[%s1397_s5 + $0x1a0] sm:$0xff] }
  0x55   :  { %831 = vmatprep.subr.mxu0 %v359_v8  ;;  %v447_v8 = vld [vmem:[%s1396_s4] sm:$0xff]  ;;  %488 = vmatprep.subr.mxu1 %v448_v7  ;;  %v606_v7 = vld [vmem:[%s1397_s5 + $0x10] sm:$0xff] }
  0x56   :  { %832 = vmatpush3.msra.mxu0 %v343_v9  ;;  %v994_v9 = vmov 0.0   ;;  %489 = vmatpush1.msra.mxu1 %v447_v8  ;;  %v640_v8 = vld [vmem:[%s1397_s5 + $0x120] sm:$0xff] }
  0x57   :  { %833 = vmatprep.subr.mxu0 %v358_v10  ;;  %522 = vmatprep.mubr.f32.mxu1 %v994_v9  ;;  %v454_v10 = vld [vmem:[%s1396_s4 + $0x38] sm:$0xff] }
  0x58   :  { %834 = vmatpush3.msra.mxu0 %v342_v11  ;;  %557 = vmatprep.subr.mxu1 %v454_v10  ;;  %v667_v11 = vld [vmem:[%s1397_s5 + $0x1f8] sm:$0xff] }
  0x59   :  { %835 = vmatprep.subr.mxu0 %v357_v12  ;;  %v651_v12 = vld [vmem:[%s1397_s5 + $0x178] sm:$0xff] }
  0x5a   :  { %836 = vmatpush3.msra.mxu0 %v341_v13  ;;  %v666_v13 = vld [vmem:[%s1397_s5 + $0x1f0] sm:$0xff]  ;;  %v655_v10 = vld [vmem:[%s1397_s5 + $0x198] sm:$0xff] }
  0x5b   :  { %837 = vmatprep.subr.mxu0 %v356_v14  ;;  %v650_v14 = vld [vmem:[%s1397_s5 + $0x170] sm:$0xff] }
  0x5c   :  { %838 = vmatpush3.msra.mxu0 %v340_v15  ;;  %v665_v15 = vld [vmem:[%s1397_s5 + $0x1e8] sm:$0xff] }
  0x5d   :  { %839 = vmatprep.subr.mxu0 %v355_v16  ;;  %v649_v16 = vld [vmem:[%s1397_s5 + $0x168] sm:$0xff] }
  0x5e   :  { %840 = vmatpush3.msra.mxu0 %v339_v17  ;;  %v664_v17 = vld [vmem:[%s1397_s5 + $0x1e0] sm:$0xff] }
  0x5f   :  { %841 = vmatprep.subr.mxu0 %v354_v18  ;;  %v648_v18 = vld [vmem:[%s1397_s5 + $0x160] sm:$0xff] }
  0x60   :  { %842 = vmatpush3.msra.mxu0 %v338_v19  ;;  %v663_v19 = vld [vmem:[%s1397_s5 + $0x1d8] sm:$0xff] }
  0x61   :  { %843 = vmatprep.subr.mxu0 %v353_v20  ;;  %v647_v20 = vld [vmem:[%s1397_s5 + $0x158] sm:$0xff] }
  0x62   :  { %844 = vmatpush3.msra.mxu0 %v337_v21  ;;  %v662_v21 = vld [vmem:[%s1397_s5 + $0x1d0] sm:$0xff] }
  0x63   :  { %845 = vmatprep.subr.mxu0 %v352_v22  ;;  %v646_v22 = vld [vmem:[%s1397_s5 + $0x150] sm:$0xff] }
  0x64   :  { %846 = vmatpush3.msra.mxu0 %v336_v23  ;;  %v661_v23 = vld [vmem:[%s1397_s5 + $0x1c8] sm:$0xff] }
  0x65   :  { %847 = vmatprep.subr.mxu0 %v351_v24  ;;  %v645_v24 = vld [vmem:[%s1397_s5 + $0x148] sm:$0xff] }
  0x66   :  { %848 = vmatpush3.msra.mxu0 %v335_v25  ;;  %v660_v25 = vld [vmem:[%s1397_s5 + $0x1c0] sm:$0xff] }
  0x67   :  { %849 = vmatprep.subr.mxu0 %v350_v26  ;;  %v644_v26 = vld [vmem:[%s1397_s5 + $0x140] sm:$0xff] }
  0x68   :  { %850 = vmatpush3.msra.mxu0 %v334_v27  ;;  %v659_v27 = vld [vmem:[%s1397_s5 + $0x1b8] sm:$0xff] }
  0x69   :  { %851 = vmatprep.subr.mxu0 %v349_v28  ;;  %v643_v28 = vld [vmem:[%s1397_s5 + $0x138] sm:$0xff] }
  0x6a   :  { %852 = vmatpush3.msra.mxu0 %v333_v29  ;;  %v658_v29 = vld [vmem:[%s1397_s5 + $0x1b0] sm:$0xff] }
  0x6b   :  { %853 = vmatprep.subr.mxu0 %v348_v30  ;;  %v642_v30 = vld [vmem:[%s1397_s5 + $0x130] sm:$0xff] }
  0x6c   :  { %854 = vmatpush3.msra.mxu0 %v332_v31  ;;  %v657_v31 = vld [vmem:[%s1397_s5 + $0x1a8] sm:$0xff] }
  0x6d   :  { %855 = vmatprep.subr.mxu0 %v347_v32  ;;  %v641_v32 = vld [vmem:[%s1397_s5 + $0x128] sm:$0xff] }
  0x6e   :  { %856 = vmatpush3.msra.mxu0 %v331_v33 }
  0x6f   :  { %857 = vmatprep.subr.mxu0 %v346_v34 }
  0x70   :  { %858 = vmatpush3.msra.mxu0 %v330_v35 }
  0x71   :  { %897 = vmatprep.subr.mxu0 %v667_v11  ;;  %v605_v11 = vld [vmem:[%s1397_s5 + $0x8] sm:$0xff] }
 0x110   :  { %v252_v43 = vpop.f32.mrf.mxu0 }
 0x111   :  { %v323_v44 = vpop.f32.mrf.mxu1  ;;  %v253_v45 = vadd.f32 %v252_v43, %v179_v41  ;;  %v634_v41 = vld [vmem:[%s1397_s5 + $0xf0] sm:$0xff]  ;;  %v633_v43 = vld [vmem:[%s1397_s5 + $0xe8] sm:$0xff] }
 0x112   :  { %v254_v46 = vpop.f32.mrf.mxu0 }
 0x113   :  { %v255_v47 = vadd.f32 %v254_v46, %v183_v42  ;;  %v324_v48 = vadd.f32 %v323_v44, %v253_v45  ;;  %v325_v49 = vpop.f32.mrf.mxu1  ;;  %v618_v42 = vld [vmem:[%s1397_s5 + $0x70] sm:$0xff]  ;;  %v617_v44 = vld [vmem:[%s1397_s5 + $0x68] sm:$0xff]  ;;  %v632_v45 = vld [vmem:[%s1397_s5 + $0xe0] sm:$0xff] }
 0x114   :  { %v616_v46 = vld [vmem:[%s1397_s5 + $0x60] sm:$0xff] }
 0x115   :  { %v326_v50 = vadd.f32 %v325_v49, %v255_v47  ;;  %v631_v47 = vld [vmem:[%s1397_s5 + $0xd8] sm:$0xff]  ;;  %v630_v49 = vld [vmem:[%s1397_s5 + $0xd0] sm:$0xff] }
 0x117   :  { %937 = vtanh.f32 %v326_v50  ;;  %v614_v50 = vld [vmem:[%s1397_s5 + $0x50] sm:$0xff] }
 0x118   :  { %939 = vtanh.f32 %v324_v48  ;;  %v615_v48 = vld [vmem:[%s1397_s5 + $0x58] sm:$0xff] }
 0x124   :  { %v938_v51 = vpop.eup %937 }
 0x125   :  { %v940_v52 = vpop.eup %939  ;;  %428 = vmatprep.mubr.f32.mxu0 %v938_v51  ;;  %v629_v51 = vld [vmem:[%s1397_s5 + $0xc8] sm:$0xff] }
 0x126   :  { %429 = vmatmul.mubr.f32.vlgmr.msra.gmra.mxu0 %v940_v52  ;;  %v613_v52 = vld [vmem:[%s1397_s5 + $0x48] sm:$0xff] }
 0x127   :  { %898 = vmatpush3.msra.mxu0 %v651_v12  ;;  %v639_v12 = vld [vmem:[%s1397_s5 + $0x118] sm:$0xff] }
 0x128   :  { %899 = vmatprep.subr.mxu0 %v666_v13  ;;  %v620_v13 = vld [vmem:[%s1397_s5 + $0x80] sm:$0xff] }
 0x129   :  { %900 = vmatpush3.msra.mxu0 %v650_v14  ;;  %v654_v14 = vld [vmem:[%s1397_s5 + $0x190] sm:$0xff] }
 0x12a   :  { %901 = vmatprep.subr.mxu0 %v665_v15  ;;  %v604_v15 = vld [vmem:[%s1397_s5] sm:$0xff] }
 0x12b   :  { %902 = vmatpush3.msra.mxu0 %v649_v16  ;;  %v638_v16 = vld [vmem:[%s1397_s5 + $0x110] sm:$0xff] }
 0x12c   :  { %903 = vmatprep.subr.mxu0 %v664_v17  ;;  %v653_v17 = vld [vmem:[%s1397_s5 + $0x188] sm:$0xff] }
 0x12d   :  { %904 = vmatpush3.msra.mxu0 %v648_v18  ;;  %v637_v18 = vld [vmem:[%s1397_s5 + $0x108] sm:$0xff] }
 0x12e   :  { %905 = vmatprep.subr.mxu0 %v663_v19  ;;  %v652_v19 = vld [vmem:[%s1397_s5 + $0x180] sm:$0xff] }
 0x12f   :  { %906 = vmatpush3.msra.mxu0 %v647_v20  ;;  %v636_v20 = vld [vmem:[%s1397_s5 + $0x100] sm:$0xff] }
 0x130   :  { %907 = vmatprep.subr.mxu0 %v662_v21 }
 0x131   :  { %908 = vmatpush3.msra.mxu0 %v646_v22 }
 0x132   :  { %909 = vmatprep.subr.mxu0 %v661_v23 }
 0x133   :  { %910 = vmatpush3.msra.mxu0 %v645_v24 }
 0x134   :  { %911 = vmatprep.subr.mxu0 %v660_v25 }
 0x135   :  { %912 = vmatpush3.msra.mxu0 %v644_v26 }
 0x136   :  { %913 = vmatprep.subr.mxu0 %v659_v27 }
 0x137   :  { %914 = vmatpush3.msra.mxu0 %v643_v28 }
 0x138   :  { %915 = vmatprep.subr.mxu0 %v658_v29 }
 0x139   :  { %916 = vmatpush3.msra.mxu0 %v642_v30 }
 0x13a   :  { %917 = vmatprep.subr.mxu0 %v657_v31 }
 0x13b   :  { %918 = vmatpush3.msra.mxu0 %v641_v32 }
 0x13c   :  { %919 = vmatprep.subr.mxu0 %v656_v6 }
 0x13d   :  { %920 = vmatpush3.msra.mxu0 %v640_v8 }
 0x13e   :  { %921 = vmatprep.subr.mxu0 %v655_v10 }
 0x13f   :  { %922 = vmatpush3.msra.mxu0 %v639_v12 }
 0x140   :  { %923 = vmatprep.subr.mxu0 %v654_v14 }
 0x141   :  { %924 = vmatpush3.msra.mxu0 %v638_v16 }
 0x142   :  { %925 = vmatprep.subr.mxu0 %v653_v17 }
 0x143   :  { %926 = vmatpush3.msra.mxu0 %v637_v18 }
 0x144   :  { %927 = vmatprep.subr.mxu0 %v652_v19 }
 0x145   :  { %928 = vmatpush3.msra.mxu0 %v636_v20 }
 0x1e6   :  { %v859_v53 = vpop.f32.mrf.mxu0 }
 0x1e8   :  { %v860_v55 = vpop.f32.mrf.mxu0 }
 0x1e9   :  { %v861_v56 = vadd.f32 %v860_v55, %v859_v53  ;;  %v628_v53 = vld [vmem:[%s1397_s5 + $0xc0] sm:$0xff]  ;;  %v627_v55 = vld [vmem:[%s1397_s5 + $0xb8] sm:$0xff] }
 0x1eb   :  { %v431_v57 = vadd.f32 %v861_v56, %v363_v54  ;;  %v612_v54 = vld [vmem:[%s1397_s5 + $0x40] sm:$0xff]  ;;  %v611_v56 = vld [vmem:[%s1397_s5 + $0x38] sm:$0xff] }
 0x1ed   :  { %941 = vtanh.f32 %v431_v57  ;;  %v626_v57 = vld [vmem:[%s1397_s5 + $0xb0] sm:$0xff] }
 0x1fa   :  { %v942_v58 = vpop.eup %941 }
 0x1fb   :  { %v436_v59 = vsel %vm435_vm0, %v942_v58, -inf }
 0x1fc   :  { %437 = vmax.xlane.f32.xlu0 %v436_v59  ;;  %v625_v59 = vld [vmem:[%s1397_s5 + $0xa8] sm:$0xff] }
 0x285   :  { %v438_v60 = vpop.xlane.xlu0 %437 }
 0x286   :  { %v439_v61 = vsub.f32 %v942_v58, %v438_v60  ;;  %v610_v58 = vld [vmem:[%s1397_s5 + $0x30] sm:$0xff]  ;;  %v609_v60 = vld [vmem:[%s1397_s5 + $0x28] sm:$0xff] }
 0x288   :  { %v440_v62 = vmul.f32 1.442695, %v439_v61  ;;  %v624_v61 = vld [vmem:[%s1397_s5 + $0xa0] sm:$0xff] }
 0x28a   :  { %943 = vpow2.f32 %v440_v62  ;;  %v608_v62 = vld [vmem:[%s1397_s5 + $0x20] sm:$0xff] }
 0x297   :  { %v944_v0 = vpop.eup %943 }
 0x298   :  { %v442_v4 = vsel %vm435_vm0, %v944_v0, 0.0 }
 0x299   :  { %443 = vadd.xlane.f32.xlu0 %v442_v4  ;;  %v607_v4 = vld [vmem:[%s1397_s5 + $0x18] sm:$0xff] }
 0x322   :  { %v444_v33 = vpop.xlane.xlu0 %443 }
 0x323   :  { %945 = vrcp.f32 %v444_v33 }
 0x330   :  { %v946_v34 = vpop.eup %945 }
 0x331   :  { %v446_v35 = vmul.f32 %v946_v34, %v944_v0  ;;  %v623_v0 = vld [vmem:[%s1397_s5 + $0x98] sm:$0xff] }
 0x333   :  { %825 = vmatmul.mubr.msk.f32.vlgmr.msra.gmra.mxu1 %vm435_vm0, %v446_v35 }
 0x334   :  { %558 = vmatpush1.msra.mxu1 %v453_v36  ;;  %593 = vmatprep.mubr.f32.mxu1 %v994_v9  ;;  %v621_v9 = vld [vmem:[%s1397_s5 + $0x88] sm:$0xff]  ;;  %s995_s5 = smov [#allocation6]  }
 0x335   :  { %559 = vmatprep.subr.mxu1 %v450_v37  ;;  %s816_s1 = sshll.u32 %s995_s5, 4  ;;  %s817_s1 = int_to_ptr.vmem [resolvable:$true] %s816_s1 }
 0x336   :  { %560 = vmatpush1.msra.mxu1 %v449_v38  ;;  %s967_s6 = scalar_lea.vmem %s817_s1, 128  ;;  %p972_p6 = scmp.lt.s32.totalorder %s817_s1, %s817_s1 }
 0x337   :  { %826 = vmatmul.mubr.msk.f32.vlgmr.msra.gmra.mxu1 %vm435_vm0, %v446_v35  ;;  %862 = vmatprep.subr.mxu1 %v635_v39  ;;  %p968_p5 = scmp.ne.s32.totalorder %s817_s1, %s967_s6  ;;  %p973_p7 = scmp.lt.s32.totalorder %s967_s6, %s967_s6 }
 0x338   :  { %863 = vmatpush3.msra.mxu1 %v619_v40 }
 0x339   :  { %864 = vmatprep.subr.mxu1 %v634_v41  ;;  %p974_p8 = por %p973_p7, %p972_p6 }
 0x33a   :  { %865 = vmatpush3.msra.mxu1 %v618_v42 }
 0x33b   :  { %866 = vmatprep.subr.mxu1 %v633_v43  ;;  %p975_p9 = pnand %p974_p8, %p968_p5 }
 0x33c   :  { %867 = vmatpush3.msra.mxu1 %v617_v44 }
 0x33d   :  { %868 = vmatprep.subr.mxu1 %v632_v45 }
 0x33e   :  { %869 = vmatpush3.msra.mxu1 %v616_v46 }
 0x33f   :  { %870 = vmatprep.subr.mxu1 %v631_v47 }
 0x340   :  { %871 = vmatpush3.msra.mxu1 %v615_v48 }
 0x341   :  { %872 = vmatprep.subr.mxu1 %v630_v49 }
 0x342   :  { %873 = vmatpush3.msra.mxu1 %v614_v50 }
 0x343   :  { %874 = vmatprep.subr.mxu1 %v629_v51 }
 0x344   :  { %875 = vmatpush3.msra.mxu1 %v613_v52 }
 0x345   :  { %876 = vmatprep.subr.mxu1 %v628_v53 }
 0x346   :  { %877 = vmatpush3.msra.mxu1 %v612_v54 }
 0x347   :  { %878 = vmatprep.subr.mxu1 %v627_v55 }
 0x348   :  { %879 = vmatpush3.msra.mxu1 %v611_v56 }
 0x349   :  { %880 = vmatprep.subr.mxu1 %v626_v57 }
 0x34a   :  { %881 = vmatpush3.msra.mxu1 %v610_v58 }
 0x34b   :  { %882 = vmatprep.subr.mxu1 %v625_v59 }
 0x34c   :  { %883 = vmatpush3.msra.mxu1 %v609_v60 }
 0x34d   :  { %884 = vmatprep.subr.mxu1 %v624_v61 }
 0x34e   :  { %885 = vmatpush3.msra.mxu1 %v608_v62 }
 0x34f   :  { %886 = vmatprep.subr.mxu1 %v623_v0 }
 0x350   :  { %887 = vmatpush3.msra.mxu1 %v607_v4 }
 0x351   :  { %888 = vmatprep.subr.mxu1 %v622_v5 }
 0x352   :  { %889 = vmatpush3.msra.mxu1 %v606_v7 }
 0x353   :  { %890 = vmatprep.subr.mxu1 %v621_v9 }
 0x354   :  { %891 = vmatpush3.msra.mxu1 %v605_v11 }
 0x355   :  { %892 = vmatprep.subr.mxu1 %v620_v13 }
 0x356   :  { %893 = vmatpush3.msra.mxu1 %v604_v15 }
 0x3f3   :  { %v524_v21 = vpop.f32.mrf.mxu1 }
 0x3f4   :  { %v600_v24 = vmul.f32 %v524_v21, %v1052_v2 }
 0x3f5   :  { %v526_v22 = vpop.f32.mrf.mxu1 }
 0x3f6   :  { %v601_v23 = vmul.f32 %v526_v22, %v1042_v63 }
 0x3f7   :  { %v595_v25 = vpop.f32.mrf.mxu1 }
 0x3f8   :  { %732 = vmatprep.mubr.f32.mxu1 %v601_v23  ;;  %v602_v28 = vmul.f32 %v595_v25, %v1057_v3 }
 0x3f9   :  { %v597_v26 = vpop.f32.mrf.mxu1  ;;  %733 = vmatmul.mubr.f32.vlgmr.msra.gmra.mxu1 %v600_v24 }
 0x3fa   :  { %v603_v27 = vmul.f32 %v597_v26, %v1047_v1 }
 0x3fc   :  { %802 = vmatprep.mubr.f32.mxu0 %v603_v27 }
 0x3fd   :  { %803 = vmatmul.mubr.f32.vlgmr.msra.gmra.mxu0 %v602_v28 }
 0x4b9   :  { %v894_v29 = vpop.f32.mrf.mxu1 }
 0x4bb   :  { %v895_v30 = vpop.f32.mrf.mxu1 }
 0x4bc   :  { %v896_v33 = vadd.f32 %v895_v30, %v894_v29 }
 0x4bd   :  { %v929_v31 = vpop.f32.mrf.mxu0 }
 0x4bf   :  { %v930_v32 = vpop.f32.mrf.mxu0 }
 0x4c0   :  { %v931_v63 = vadd.f32 %v930_v32, %v929_v31 }
 0x4c2   :  { %v805_v2 = vadd.f32 %v931_v63, %v896_v33 }
 0x4c4   :  { %809 = vst.msk [vmem:[#allocation6] sm:$0xff] %vm808_vm1, %v805_v2 }
 0x4c5   :  { %978 = shalt.err (!%p975_p9)
}
 0x4c6   :  { %819 = dma.vmem_to_hbm [thread:$0]  %s817_s1, 128, %s1399_s7, [#allocation5]  }
 0x4c7   :  { %989 = dma.done.wait [#allocation5], 128  }
 0x4c8   :  { %990 = vsyncadd [#allocation5], 4294967168 }
 0x4c9   :  { %823 = vsyncpa [#allocation4], 1 }
 0x4ca   :  { %824 = vsyncpa [#allocation5], 1 }

</bundles_post_ra>
